<compile_context>
chip_gen: v7x
topology: tpu7x:2x2x1
jax: 0.10.0
libtpu: 0.0.40
codegen_flags: <defaults>
</compile_context>

<pallas_src>
import functools
from itertools import permutations

import jax
import jax.numpy as jnp
import numpy as np
from jax.experimental import pallas as pl
from jax.experimental.pallas import tpu as pltpu  # noqa: F401  (kept for TPU-specific tuning)


# ----------------------------------------------------------------------------- kernel
def _gnn_critic_kernel(shared_ref, node_ref,          # (B, Ds) act|body ; (N*B, Dn) obj|edge
                       wps_ref, wpn_ref, bp1_ref,     # phi layer 1: (Ds,2H) bf16, (Dn,2H) bf16, (1,2H) f32
                       wp2_ref, bp2_ref,              # phi layer 2: (2H,2P) bf16 block-diag, (1,2P) f32
                       wr1_ref, br1_ref,              # rho layer 1: (2P,2RH) bf16 block-diag, (1,2RH) f32
                       rw2v_ref, rb2_ref,             # rho layer 2 head 1: (1,RH) f32, (1,1) f32
                       rw4v_ref, rb4_ref,             # rho layer 2 head 2: (1,RH) f32, (1,1) f32
                       q1_ref, q2_ref,                # outputs: (B,1) f32 each
                       *, n_nodes, batch):
    bf16 = jnp.bfloat16
    f32 = jnp.float32

    shared = shared_ref[...].astype(bf16)             # (B, Ds)   features shared across nodes
    node = node_ref[...].astype(bf16)                 # (N*B, Dn) per-node features

    # phi layer 1, both critic heads side by side in the 2H output columns.
    hs = jnp.dot(shared, wps_ref[...], preferred_element_type=f32) + bp1_ref[...]   # (B, 2H)
    hn = jnp.dot(node, wpn_ref[...], preferred_element_type=f32)                    # (N*B, 2H)
    h = jnp.maximum(hn.reshape(n_nodes, batch, hn.shape[-1]) + hs[None], 0.0)       # (N, B, 2H)

    # phi layer 2 (block-diagonal fused weights keep the two heads independent).
    h2 = h.reshape(n_nodes * batch, h.shape[-1]).astype(bf16)                        # (N*B, 2H)
    o = jnp.maximum(
        jnp.dot(h2, wp2_ref[...], preferred_element_type=f32) + bp2_ref[...], 0.0)  # (N*B, 2P)

    # readout == 'sum' over the node axis.
    acc = o.reshape(n_nodes, batch, o.shape[-1]).sum(axis=0)                         # (B, 2P)

    # rho layer 1 (block-diagonal fused heads).
    z = jnp.maximum(
        jnp.dot(acc.astype(bf16), wr1_ref[...], preferred_element_type=f32)
        + br1_ref[...], 0.0)                                                         # (B, 2RH)

    # rho layer 2: scalar Q heads as VPU multiply + lane reduction (dim_rho_out == 1).
    rh = rw2v_ref.shape[-1]
    q1_ref[...] = jnp.sum(z[:, :rh] * rw2v_ref[...], axis=-1, keepdims=True) + rb2_ref[...]
    q2_ref[...] = jnp.sum(z[:, rh:] * rw4v_ref[...], axis=-1, keepdims=True) + rb4_ref[...]


# ----------------------------------------------------------------------------- jitted forward
def _gnn_critic_forward(params, agg_mat, obs, act, edge_features,
                        *, nb_objects, dim_body, dim_object):
    (wps, wpn, bp1, wp2, bp2, wr1, br1, rw2v, rb2, rw4v, rb4) = params
    B = obs.shape[0]

    obs_body = obs[:, :dim_body]                                                    # (B, db)
    obs_obj = jnp.transpose(obs[:, dim_body:].reshape(B, nb_objects, dim_object),
                            (1, 0, 2))                                              # (N, B, do)
    # aggregation == 'sum' over incoming edges as one 0/1-matrix contraction
    # (a node with no incoming edges gets an all-zero row -> zero aggregate, as in torch).
    edge_agg = jnp.einsum('ne,ebd->nbd', agg_mat, edge_features)                    # (N, B, de)

    shared = jnp.concatenate([act, obs_body], axis=-1)                              # (B, da+db)
    node = jnp.concatenate([obs_obj, edge_agg], axis=-1)                            # (N, B, do+de)
    node = node.reshape(nb_objects * B, node.shape[-1])                             # (N*B, Dn)

    kernel = functools.partial(_gnn_critic_kernel, n_nodes=nb_objects, batch=B)

    operands = (shared, node, wps, wpn, bp1, wp2, bp2, wr1, br1, rw2v, rb2, rw4v, rb4)
    h2 = wps.shape[1]
    p2 = wp2.shape[1]
    rh2 = wr1.shape[1]
    flops = 2 * (shared.shape[0] * shared.shape[1] * h2
                 + node.shape[0] * node.shape[1] * h2
                 + node.shape[0] * h2 * p2
                 + B * p2 * rh2
                 + B * rh2)
    bytes_accessed = int(sum(int(np.prod(a.shape)) * a.dtype.itemsize for a in operands)
                         + 2 * B * 4)

    # Single invocation (no grid): every operand is a full-array VMEM block, so the weights
    # are DMA'd exactly once and nothing is double-buffered.
    q1, q2 = pl.pallas_call(
        kernel,
        out_shape=(jax.ShapeDtypeStruct((B, 1), jnp.float32),
                   jax.ShapeDtypeStruct((B, 1), jnp.float32)),
        cost_estimate=pl.CostEstimate(flops=flops, transcendentals=0,
                                      bytes_accessed=bytes_accessed),
    )(*operands)
    return q1, q2


# ----------------------------------------------------------------------------- wrapper
class GnnCriticPallas:
    def __init__(self, nb_objects, incoming_edges, dim_body, dim_object, dim_act,
                 dim_edge, dim_phi_hidden, dim_phi_out, dim_rho_hidden, dim_rho_out,
                 key):
        assert dim_rho_out == 1, "lane-reduction rho head assumes a scalar Q output"
        self.nb_objects = nb_objects
        self.dim_body = dim_body
        self.dim_object = dim_object
        self.dim_act = dim_act
        self.dim_edge = dim_edge
        self.dim_phi_in = dim_act + dim_body + dim_object + dim_edge

        def linear(k, d_in, d_out):
            kw, kb = jax.random.split(k)
            bound = 1.0 / np.sqrt(d_in)
            # stored as [in, out] so x @ W matches torch's x @ weight.T
            w = jax.random.uniform(kw, (d_in, d_out), jnp.float32, -bound, bound)
            b = jax.random.uniform(kb, (1, d_out), jnp.float32, -bound, bound)
            return w, b

        ks = jax.random.split(key, 8)
        # phi_critic (two parallel 2-layer MLPs, ReLU on both layers)
        self.w1, self.b1 = linear(ks[0], self.dim_phi_in, dim_phi_hidden)
        self.w2, self.b2 = linear(ks[1], dim_phi_hidden, dim_phi_out)
        self.w3, self.b3 = linear(ks[2], self.dim_phi_in, dim_phi_hidden)
        self.w4, self.b4 = linear(ks[3], dim_phi_hidden, dim_phi_out)
        # rho_critic (two parallel 2-layer MLPs, ReLU hidden, linear scalar head)
        self.rw1, self.rb1 = linear(ks[4], dim_phi_out, dim_rho_hidden)
        self.rw2, self.rb2 = linear(ks[5], dim_rho_hidden, dim_rho_out)
        self.rw3, self.rb3 = linear(ks[6], dim_phi_out, dim_rho_hidden)
        self.rw4, self.rb4 = linear(ks[7], dim_rho_hidden, dim_rho_out)

        # ---- fused / compact kernel parameters (weights bf16, biases f32) ----
        H, P, RH = dim_phi_hidden, dim_phi_out, dim_rho_hidden
        ds = dim_act + dim_body                       # features shared across nodes
        wp1 = jnp.concatenate([self.w1, self.w3], axis=1)                 # (Din, 2H)
        self.wps = wp1[:ds].astype(jnp.bfloat16)                          # (Ds, 2H)
        self.wpn = wp1[ds:].astype(jnp.bfloat16)                          # (Dn, 2H)
        self.bp1 = jnp.concatenate([self.b1, self.b3], axis=1)            # (1, 2H)
        self.wp2 = (jnp.zeros((2 * H, 2 * P), jnp.float32)
                    .at[:H, :P].set(self.w2).at[H:, P:].set(self.w4)
                    ).astype(jnp.bfloat16)                                # (2H, 2P) block-diag
        self.bp2 = jnp.concatenate([self.b2, self.b4], axis=1)            # (1, 2P)
        self.wr1 = (jnp.zeros((2 * P, 2 * RH), jnp.float32)
                    .at[:P, :RH].set(self.rw1).at[P:, RH:].set(self.rw3)
                    ).astype(jnp.bfloat16)                                # (2P, 2RH) block-diag
        self.br1 = jnp.concatenate([self.rb1, self.rb3], axis=1)          # (1, 2RH)
        self.rw2v = jnp.transpose(self.rw2)                               # (1, RH) f32
        self.rw4v = jnp.transpose(self.rw4)                               # (1, RH) f32

        # 0/1 edge-aggregation matrix: row i sums the incoming edges of node i.
        n_edges = nb_objects * (nb_objects - 1)
        agg = np.zeros((nb_objects, n_edges), np.float32)
        for i, es in enumerate(incoming_edges):
            for e in es:
                agg[i, int(e)] = 1.0
        self.agg_mat = jnp.asarray(agg)

        self._params = (self.wps, self.wpn, self.bp1, self.wp2, self.bp2,
                        self.wr1, self.br1, self.rw2v, self.rb2, self.rw4v, self.rb4)
        self._jit_forward = jax.jit(functools.partial(
            _gnn_critic_forward, nb_objects=nb_objects,
            dim_body=dim_body, dim_object=dim_object))

    def __call__(self, obs, act, edge_features):
        return self._jit_forward(self._params, self.agg_mat, obs, act, edge_features)

    # ---- pure-JAX reference (unfused, mirrors the torch forward) ----
    # Matmul weights are rounded to bf16 (the same quantization the kernel stores) but all
    # math is f32, so the comparison isolates fusion/layout correctness from quantization.
    def reference(self, obs, act, edge_features):
        qz = lambda w: w.astype(jnp.bfloat16).astype(jnp.float32)
        obs_body = obs[:, :self.dim_body]
        obs_objects = [obs[:, self.dim_body + self.dim_object * i:
                           self.dim_body + self.dim_object * (i + 1)]
                       for i in range(self.nb_objects)]
        edge_agg = jnp.einsum('ne,ebd->nbd', self.agg_mat, edge_features)   # aggregation='sum'
        inp = jnp.stack([jnp.concatenate([act, obs_body, obs_objects[i], edge_agg[i]], axis=1)
                         for i in range(self.nb_objects)])                  # (N, B, Din)
        h1 = jax.nn.relu(inp @ qz(self.w1) + self.b1)
        o1 = jax.nn.relu(h1 @ qz(self.w2) + self.b2)
        h2 = jax.nn.relu(inp @ qz(self.w3) + self.b3)
        o2 = jax.nn.relu(h2 @ qz(self.w4) + self.b4)
        o1 = o1.sum(axis=0)          # readout='sum'
        o2 = o2.sum(axis=0)
        q1 = jax.nn.relu(o1 @ qz(self.rw1) + self.rb1) @ self.rw2 + self.rb2
        q2 = jax.nn.relu(o2 @ qz(self.rw3) + self.rb3) @ self.rw4 + self.rb4
        return q1, q2


# ----------------------------------------------------------------------------- main
if __name__ == "__main__":
    # small, forward-consistent shapes
    nb_objects = 3
    dim_body, dim_object, dim_act, dim_edge = 10, 15, 4, 32
    B = 8
    edges = list(permutations(range(nb_objects), 2))          # 6 directed edges
    n_edges = len(edges)
    incoming_edges = [[e for e, (src, dst) in enumerate(edges) if dst == i]
                      for i in range(nb_objects)]

    key = jax.random.PRNGKey(0)
    k_params, k_obs, k_act, k_edge = jax.random.split(key, 4)

    critic = GnnCriticPallas(
        nb_objects=nb_objects, incoming_edges=incoming_edges,
        dim_body=dim_body, dim_object=dim_object, dim_act=dim_act, dim_edge=dim_edge,
        dim_phi_hidden=256, dim_phi_out=64, dim_rho_hidden=256, dim_rho_out=1,
        key=k_params)

    obs = jax.random.normal(k_obs, (B, dim_body + nb_objects * dim_object), jnp.float32)
    act = jax.random.normal(k_act, (B, dim_act), jnp.float32)
    edge_features = jax.random.normal(k_edge, (n_edges, B, dim_edge), jnp.float32)

    q1, q2 = critic(obs, act, edge_features)
    jax.block_until_ready((q1, q2))

    q1_ref, q2_ref = critic.reference(obs, act, edge_features)
    # bf16 activations inside the kernel vs f32 reference -> loosened tolerance.
    np.testing.assert_allclose(np.asarray(q1), np.asarray(q1_ref), rtol=2e-2, atol=2e-2)
    np.testing.assert_allclose(np.asarray(q2), np.asarray(q2_ref), rtol=2e-2, atol=2e-2)

    print("KERNEL_OK")
</pallas_src>

<mosaic_0001>
module attributes {stable_mosaic.version = 11 : i64} {
  func.func @_gnn_critic_kernel(%arg0: memref<8x14xf32, #tpu.memory_space<vmem>>, %arg1: memref<24x47xf32, #tpu.memory_space<vmem>>, %arg2: memref<14x512xbf16, #tpu.memory_space<vmem>>, %arg3: memref<47x512xbf16, #tpu.memory_space<vmem>>, %arg4: memref<1x512xf32, #tpu.memory_space<vmem>>, %arg5: memref<512x128xbf16, #tpu.memory_space<vmem>>, %arg6: memref<1x128xf32, #tpu.memory_space<vmem>>, %arg7: memref<128x512xbf16, #tpu.memory_space<vmem>>, %arg8: memref<1x512xf32, #tpu.memory_space<vmem>>, %arg9: memref<1x256xf32, #tpu.memory_space<vmem>>, %arg10: memref<1x1xf32, #tpu.memory_space<vmem>>, %arg11: memref<1x256xf32, #tpu.memory_space<vmem>>, %arg12: memref<1x1xf32, #tpu.memory_space<vmem>>, %arg13: memref<8x1xf32, #tpu.memory_space<vmem>>, %arg14: memref<8x1xf32, #tpu.memory_space<vmem>>) attributes {dimension_semantics = [], scalar_prefetch = 0 : i64, scratch_operands = 0 : i64, tpu.core_type = #tpu.core_type<tc>} {
    %c0 = arith.constant 0 : index
    %c0_0 = arith.constant 0 : index
    %0 = vector.load %arg0[%c0, %c0_0] : memref<8x14xf32, #tpu.memory_space<vmem>>, vector<8x14xf32>
    %1 = arith.truncf %0 : vector<8x14xf32> to vector<8x14xbf16>
    %c0_1 = arith.constant 0 : index
    %c0_2 = arith.constant 0 : index
    %2 = vector.load %arg1[%c0_1, %c0_2] : memref<24x47xf32, #tpu.memory_space<vmem>>, vector<24x47xf32>
    %3 = arith.truncf %2 : vector<24x47xf32> to vector<24x47xbf16>
    %c0_3 = arith.constant 0 : index
    %c0_4 = arith.constant 0 : index
    %4 = vector.load %arg2[%c0_3, %c0_4] : memref<14x512xbf16, #tpu.memory_space<vmem>>, vector<14x512xbf16>
    %cst = arith.constant dense<0.000000e+00> : vector<8x512xf32>
    %5 = tpu.matmul %1, %4, %cst {dimension_numbers = #tpu.dot_dimension_numbers<[1], [0], [0], [1], [0, 0, 1, 1], [], []>} : vector<8x14xbf16>, vector<14x512xbf16>, vector<8x512xf32> -> vector<8x512xf32>
    %c0_5 = arith.constant 0 : index
    %c0_6 = arith.constant 0 : index
    %6 = vector.load %arg4[%c0_5, %c0_6] : memref<1x512xf32, #tpu.memory_space<vmem>>, vector<1x512xf32>
    %7 = vector.broadcast %6 : vector<1x512xf32> to vector<8x512xf32>
    %8 = arith.addf %5, %7 : vector<8x512xf32>
    %c0_7 = arith.constant 0 : index
    %c0_8 = arith.constant 0 : index
    %9 = vector.load %arg3[%c0_7, %c0_8] : memref<47x512xbf16, #tpu.memory_space<vmem>>, vector<47x512xbf16>
    %cst_9 = arith.constant dense<0.000000e+00> : vector<24x512xf32>
    %10 = tpu.matmul %3, %9, %cst_9 {dimension_numbers = #tpu.dot_dimension_numbers<[1], [0], [0], [1], [0, 0, 1, 1], [], []>} : vector<24x47xbf16>, vector<47x512xbf16>, vector<24x512xf32> -> vector<24x512xf32>
    %11 = vector.shape_cast %10 : vector<24x512xf32> to vector<3x8x512xf32>
    %12 = vector.shape_cast %8 : vector<8x512xf32> to vector<1x8x512xf32>
    %13 = vector.broadcast %12 : vector<1x8x512xf32> to vector<3x8x512xf32>
    %14 = arith.addf %11, %13 : vector<3x8x512xf32>
    %cst_10 = arith.constant 0.000000e+00 : f32
    %15 = vector.broadcast %cst_10 : f32 to vector<3x8x512xf32>
    %16 = arith.maximumf %14, %15 : vector<3x8x512xf32>
    %17 = vector.shape_cast %16 : vector<3x8x512xf32> to vector<24x512xf32>
    %18 = arith.truncf %17 : vector<24x512xf32> to vector<24x512xbf16>
    %c0_11 = arith.constant 0 : index
    %c0_12 = arith.constant 0 : index
    %19 = vector.load %arg5[%c0_11, %c0_12] : memref<512x128xbf16, #tpu.memory_space<vmem>>, vector<512x128xbf16>
    %cst_13 = arith.constant dense<0.000000e+00> : vector<24x128xf32>
    %20 = tpu.matmul %18, %19, %cst_13 {dimension_numbers = #tpu.dot_dimension_numbers<[1], [0], [0], [1], [0, 0, 1, 1], [], []>} : vector<24x512xbf16>, vector<512x128xbf16>, vector<24x128xf32> -> vector<24x128xf32>
    %c0_14 = arith.constant 0 : index
    %c0_15 = arith.constant 0 : index
    %21 = vector.load %arg6[%c0_14, %c0_15] : memref<1x128xf32, #tpu.memory_space<vmem>>, vector<1x128xf32>
    %22 = vector.broadcast %21 : vector<1x128xf32> to vector<24x128xf32>
    %23 = arith.addf %20, %22 : vector<24x128xf32>
    %cst_16 = arith.constant 0.000000e+00 : f32
    %24 = vector.broadcast %cst_16 : f32 to vector<24x128xf32>
    %25 = arith.maximumf %23, %24 : vector<24x128xf32>
    %26 = vector.shape_cast %25 : vector<24x128xf32> to vector<3x8x128xf32>
    %cst_17 = arith.constant dense<0.000000e+00> : vector<8x128xf32>
    %27 = vector.multi_reduction <add>, %26, %cst_17 [0] : vector<3x8x128xf32> to vector<8x128xf32>
    %28 = arith.truncf %27 : vector<8x128xf32> to vector<8x128xbf16>
    %c0_18 = arith.constant 0 : index
    %c0_19 = arith.constant 0 : index
    %29 = vector.load %arg7[%c0_18, %c0_19] : memref<128x512xbf16, #tpu.memory_space<vmem>>, vector<128x512xbf16>
    %cst_20 = arith.constant dense<0.000000e+00> : vector<8x512xf32>
    %30 = tpu.matmul %28, %29, %cst_20 {dimension_numbers = #tpu.dot_dimension_numbers<[1], [0], [0], [1], [0, 0, 1, 1], [], []>} : vector<8x128xbf16>, vector<128x512xbf16>, vector<8x512xf32> -> vector<8x512xf32>
    %c0_21 = arith.constant 0 : index
    %c0_22 = arith.constant 0 : index
    %31 = vector.load %arg8[%c0_21, %c0_22] : memref<1x512xf32, #tpu.memory_space<vmem>>, vector<1x512xf32>
    %32 = vector.broadcast %31 : vector<1x512xf32> to vector<8x512xf32>
    %33 = arith.addf %30, %32 : vector<8x512xf32>
    %cst_23 = arith.constant 0.000000e+00 : f32
    %34 = vector.broadcast %cst_23 : f32 to vector<8x512xf32>
    %35 = arith.maximumf %33, %34 : vector<8x512xf32>
    %36 = vector.extract_strided_slice %35 {offsets = [0, 0], sizes = [8, 256], strides = [1, 1]} : vector<8x512xf32> to vector<8x256xf32>
    %c0_24 = arith.constant 0 : index
    %c0_25 = arith.constant 0 : index
    %37 = vector.load %arg9[%c0_24, %c0_25] : memref<1x256xf32, #tpu.memory_space<vmem>>, vector<1x256xf32>
    %38 = vector.broadcast %37 : vector<1x256xf32> to vector<8x256xf32>
    %39 = arith.mulf %36, %38 : vector<8x256xf32>
    %cst_26 = arith.constant dense<0.000000e+00> : vector<8xf32>
    %40 = vector.multi_reduction <add>, %39, %cst_26 [1] : vector<8x256xf32> to vector<8xf32>
    %41 = vector.shape_cast %40 : vector<8xf32> to vector<8x1xf32>
    %c0_27 = arith.constant 0 : index
    %c0_28 = arith.constant 0 : index
    %42 = vector.load %arg10[%c0_27, %c0_28] : memref<1x1xf32, #tpu.memory_space<vmem>>, vector<1x1xf32>
    %43 = vector.broadcast %42 : vector<1x1xf32> to vector<8x1xf32>
    %44 = arith.addf %41, %43 : vector<8x1xf32>
    %c0_29 = arith.constant 0 : index
    %c0_30 = arith.constant 0 : index
    %45 = vector.load %arg13[%c0_29, %c0_30] : memref<8x1xf32, #tpu.memory_space<vmem>>, vector<8x1xf32>
    tpu.vector_store %arg13[%c0_29, %c0_30], %44 {strides = array<i32>} : memref<8x1xf32, #tpu.memory_space<vmem>>, vector<8x1xf32>,
    %46 = vector.extract_strided_slice %35 {offsets = [0, 256], sizes = [8, 256], strides = [1, 1]} : vector<8x512xf32> to vector<8x256xf32>
    %c0_31 = arith.constant 0 : index
    %c0_32 = arith.constant 0 : index
    %47 = vector.load %arg11[%c0_31, %c0_32] : memref<1x256xf32, #tpu.memory_space<vmem>>, vector<1x256xf32>
    %48 = vector.broadcast %47 : vector<1x256xf32> to vector<8x256xf32>
    %49 = arith.mulf %46, %48 : vector<8x256xf32>
    %cst_33 = arith.constant dense<0.000000e+00> : vector<8xf32>
    %50 = vector.multi_reduction <add>, %49, %cst_33 [1] : vector<8x256xf32> to vector<8xf32>
    %51 = vector.shape_cast %50 : vector<8xf32> to vector<8x1xf32>
    %c0_34 = arith.constant 0 : index
    %c0_35 = arith.constant 0 : index
    %52 = vector.load %arg12[%c0_34, %c0_35] : memref<1x1xf32, #tpu.memory_space<vmem>>, vector<1x1xf32>
    %53 = vector.broadcast %52 : vector<1x1xf32> to vector<8x1xf32>
    %54 = arith.addf %51, %53 : vector<8x1xf32>
    %c0_36 = arith.constant 0 : index
    %c0_37 = arith.constant 0 : index
    %55 = vector.load %arg14[%c0_36, %c0_37] : memref<8x1xf32, #tpu.memory_space<vmem>>, vector<8x1xf32>
    tpu.vector_store %arg14[%c0_36, %c0_37], %54 {strides = array<i32>} : memref<8x1xf32, #tpu.memory_space<vmem>>, vector<8x1xf32>,
    return
  }
}

</mosaic_0001>

<bundles_post_ra>
// kernel: _gnn_critic_forward.1
= control target key start
LH: loop header
LB: loop body
LE: loop exit
PB: predicated region body
PF: predicated region fallthrough
CT: control target
= control target key end

     0   :  { %s2037_s0 = inlined_call_operand.vmem [shape: f32[8,14], index: 0, kind: input, shape index: {}]   ;;  %s2038_s1 = inlined_call_operand.vmem [shape: f32[24,47], index: 1, kind: input, shape index: {}]   ;;  %s2039_s2 = inlined_call_operand.hbm [shape: bf16[14,512], index: 2, kind: input, shape index: {}]   ;;  %s2040_s3 = inlined_call_operand.vmem [shape: bf16[47,512], index: 3, kind: input, shape index: {}]   ;;  %s2041_s4 = inlined_call_operand.hbm [shape: f32[1,512], index: 4, kind: input, shape index: {}]   ;;  %s2042_s5 = inlined_call_operand.vmem [shape: bf16[512,128], index: 5, kind: input, shape index: {}]   ;;  %s2043_s6 = inlined_call_operand.hbm [shape: f32[1,128], index: 6, kind: input, shape index: {}]   ;;  %s2044_s7 = inlined_call_operand.hbm [shape: bf16[128,512], index: 7, kind: input, shape index: {}]   ;;  %s2045_s8 = inlined_call_operand.hbm [shape: f32[1,512], index: 8, kind: input, shape index: {}]   ;;  %s2046_s9 = inlined_call_operand.hbm [shape: f32[1,256], index: 9, kind: input, shape index: {}]   ;;  %s2047_s10 = inlined_call_operand.<no memory space> [shape: f32[1,1], index: 10, kind: input, shape index: {}]   ;;  %s2048_s11 = inlined_call_operand.hbm [shape: f32[1,256], index: 11, kind: input, shape index: {}]   ;;  %s2049_s13 = inlined_call_operand.vmem [shape: f32[8,1], index: 13, kind: output, shape index: {0}]   ;;  %s2050_s14 = inlined_call_operand.vmem [shape: f32[8,1], index: 14, kind: output, shape index: {1}]   ;;  %s2051_s12 = inlined_call_operand.<no memory space> [shape: f32[1,1], index: 12, kind: input, shape index: {}]  }
   0x1   :  { %v20_v0 = vstv %s2047_s10  ;;  %v22_v1 = vstv %s2051_s12 }
   0x2   :  { %21 = vst [vmem:[#allocation2] sm:$0x1] %v20_v0  ;;  %23 = vst [vmem:[#allocation3] sm:$0x1] %v22_v1 }
   0x3   :  { %24 = vsyncpa [#allocation5], 0 }
   0x4   :  { %25 = vsyncpa [#allocation7], 0 }
   0x5   :  { %26 = vsyncpa [#allocation10], 0 }
   0x6   :  { %27 = vsyncpa [#allocation13], 0  ;;  %s1662_s17 = smov [#allocation6]   ;;  %s1500_s21 = scalar_lea.hbm %s2041_s4, 64 }
   0x7   :  { %s52_s18 = sshll.u32 %s1662_s17, 4  ;;  %p1501_p0 = scmp.ne.s32.totalorder %s2041_s4, %s1500_s21  ;;  %s53_s18 = int_to_ptr.vmem [resolvable:$true] %s52_s18 }
   0x8   :  { %p1504_p1 = scmp.lt.u32.totalorder %s1500_s21, %s2041_s4 }
   0xa   :  { %p1506_p2 = pnand %p1504_p1, %p1501_p0 }
   0xc   :  { %1509 = shalt.err (!%p1506_p2)
}
   0xd   :  { %s1510_s12 = scalar_lea.vmem %s53_s18, 64  ;;  %p1515_p4 = scmp.lt.s32.totalorder %s53_s18, %s53_s18 }
   0xe   :  { %p1511_p3 = scmp.ne.s32.totalorder %s53_s18, %s1510_s12  ;;  %p1516_p5 = scmp.lt.s32.totalorder %s1510_s12, %s1510_s12 }
  0x10   :  { %p1517_p6 = por %p1516_p5, %p1515_p4 }
  0x12   :  { %p1518_p7 = pnand %p1517_p6, %p1511_p3 }
  0x14   :  { %1521 = shalt.err (!%p1518_p7)
}
  0x15   :  { %55 = dma.hbm_to_vmem [thread:$0]  %s2041_s4, 64, %s53_s18, [#allocation7]  }
  0x16   :  { %s1663_s27 = smov [#allocation9]   ;;  %s1664_s29 = smov [#allocation12]  }
  0x17   :  { %s73_s28 = sshll.u32 %s1663_s27, 4  ;;  %s96_s30 = sshll.u32 %s1664_s29, 4  ;;  %s74_s28 = int_to_ptr.vmem [resolvable:$true] %s73_s28  ;;  %s97_s30 = int_to_ptr.vmem [resolvable:$true] %s96_s30 }
  0x18   :  { %s1522_s17 = scalar_lea.hbm %s2044_s7, 4096 }
  0x19   :  { %p1523_p8 = scmp.ne.s32.totalorder %s2044_s7, %s1522_s17  ;;  %p1526_p9 = scmp.lt.u32.totalorder %s1522_s17, %s2044_s7 }
  0x1b   :  { %p1528_p10 = pnand %p1526_p9, %p1523_p8 }
  0x1d   :  { %1531 = shalt.err (!%p1528_p10)
}
  0x1e   :  { %s1532_s4 = scalar_lea.vmem %s74_s28, 4096  ;;  %p1537_p12 = scmp.lt.s32.totalorder %s74_s28, %s74_s28 }
  0x1f   :  { %p1533_p11 = scmp.ne.s32.totalorder %s74_s28, %s1532_s4  ;;  %p1538_p13 = scmp.lt.s32.totalorder %s1532_s4, %s1532_s4 }
  0x21   :  { %p1539_p0 = por %p1538_p13, %p1537_p12 }
  0x23   :  { %p1540_p1 = pnand %p1539_p0, %p1533_p11 }
  0x25   :  { %1543 = shalt.err (!%p1540_p1)
}
  0x26   :  { %s1665_s18 = smov 256   ;;  %s1666_s23 = smov 16  }
  0x27   :  { %79 = dma.hbm_to_vmem [thread:$0]  %s2044_s7, 4096, %s74_s28, [#allocation10], %s1665_s18, %s1665_s18, %s1666_s23  }
  0x28   :  { %s1544_s26 = scalar_lea.hbm %s2046_s9, 32 }
  0x29   :  { %p1545_p2 = scmp.ne.s32.totalorder %s2046_s9, %s1544_s26  ;;  %p1548_p3 = scmp.lt.u32.totalorder %s1544_s26, %s2046_s9 }
  0x2b   :  { %p1550_p4 = pnand %p1548_p3, %p1545_p2 }
  0x2d   :  { %1553 = shalt.err (!%p1550_p4)
}
  0x2e   :  { %s1554_s17 = scalar_lea.vmem %s97_s30, 32  ;;  %p1559_p6 = scmp.lt.s32.totalorder %s97_s30, %s97_s30 }
  0x2f   :  { %p1555_p5 = scmp.ne.s32.totalorder %s97_s30, %s1554_s17  ;;  %p1560_p7 = scmp.lt.s32.totalorder %s1554_s17, %s1554_s17 }
  0x31   :  { %p1561_p8 = por %p1560_p7, %p1559_p6 }
  0x33   :  { %p1562_p9 = pnand %p1561_p8, %p1555_p5 }
  0x35   :  { %1565 = shalt.err (!%p1562_p9)
}
  0x36   :  { %99 = dma.hbm_to_vmem [thread:$0]  %s2046_s9, 32, %s97_s30, [#allocation13]  }
  0x37   :  { %s1667_s19 = smov [#allocation4]   ;;  %s1668_s21 = smov [#allocation8]  }
  0x38   :  { %s37_s20 = sshll.u32 %s1667_s19, 4  ;;  %s64_s22 = sshll.u32 %s1668_s21, 4  ;;  %s38_s20 = int_to_ptr.vmem [resolvable:$true] %s37_s20  ;;  %s65_s22 = int_to_ptr.vmem [resolvable:$true] %s64_s22 }
  0x39   :  { %s1566_s24 = scalar_lea.hbm %s2039_s2, 512 }
  0x3a   :  { %p1567_p10 = scmp.ne.s32.totalorder %s2039_s2, %s1566_s24  ;;  %p1570_p11 = scmp.lt.u32.totalorder %s1566_s24, %s2039_s2 }
  0x3c   :  { %p1572_p12 = pnand %p1570_p11, %p1567_p10 }
  0x3e   :  { %1575 = shalt.err (!%p1572_p12)
}
  0x3f   :  { %s1576_s9 = scalar_lea.vmem %s38_s20, 512  ;;  %p1581_p0 = scmp.lt.s32.totalorder %s38_s20, %s38_s20 }
  0x40   :  { %p1577_p13 = scmp.ne.s32.totalorder %s38_s20, %s1576_s9  ;;  %p1582_p1 = scmp.lt.s32.totalorder %s1576_s9, %s1576_s9 }
  0x42   :  { %p1583_p2 = por %p1582_p1, %p1581_p0 }
  0x44   :  { %p1584_p3 = pnand %p1583_p2, %p1577_p13 }
  0x46   :  { %1587 = shalt.err (!%p1584_p3)
}
  0x47   :  { %43 = dma.hbm_to_vmem [thread:$0]  %s2039_s2, 512, %s38_s20, [#allocation5], %s1665_s18, %s1665_s18, %s1666_s23  }
  0x48   :  { %s1588_s17 = scalar_lea.hbm %s2043_s6, 16 }
  0x49   :  { %p1589_p4 = scmp.ne.s32.totalorder %s2043_s6, %s1588_s17  ;;  %p1592_p5 = scmp.lt.u32.totalorder %s1588_s17, %s2043_s6 }
  0x4b   :  { %p1594_p6 = pnand %p1592_p5, %p1589_p4 }
  0x4d   :  { %1597 = shalt.err (!%p1594_p6)
}
  0x4e   :  { %s1598_s4 = scalar_lea.vmem %s65_s22, 16  ;;  %s1602_s10 = scalar_lea.vmem %s65_s22, 32 }
  0x4f   :  { %p1599_p7 = scmp.ne.s32.totalorder %s65_s22, %s1598_s4  ;;  %p1603_p8 = scmp.lt.s32.totalorder %s65_s22, %s65_s22 }
  0x50   :  { %p1604_p9 = scmp.lt.s32.totalorder %s1602_s10, %s1598_s4 }
  0x52   :  { %p1605_p10 = por %p1604_p9, %p1603_p8 }
  0x54   :  { %p1606_p11 = pnand %p1605_p10, %p1599_p7 }
  0x56   :  { %1609 = shalt.err (!%p1606_p11)
}
  0x57   :  { %67 = dma.hbm_to_vmem [thread:$0]  %s2043_s6, 16, %s65_s22, [#allocation7]  }
  0x58   :  { %s1669_s23 = smov [#allocation11]   ;;  %s1670_s24 = smov [#allocation14]  }
  0x59   :  { %s86_s20 = sshll.u32 %s1669_s23, 4  ;;  %s108_s12 = sshll.u32 %s1670_s24, 4  ;;  %s87_s20 = int_to_ptr.vmem [resolvable:$true] %s86_s20  ;;  %s109_s12 = int_to_ptr.vmem [resolvable:$true] %s108_s12 }
  0x5a   :  { %s1610_s27 = scalar_lea.hbm %s2045_s8, 64 }
  0x5b   :  { %p1611_p12 = scmp.ne.s32.totalorder %s2045_s8, %s1610_s27  ;;  %p1614_p13 = scmp.lt.u32.totalorder %s1610_s27, %s2045_s8 }
  0x5d   :  { %p1616_p0 = pnand %p1614_p13, %p1611_p12 }
  0x5f   :  { %1619 = shalt.err (!%p1616_p0)
}
  0x60   :  { %s1620_s6 = scalar_lea.vmem %s87_s20, 64  ;;  %p1625_p2 = scmp.lt.s32.totalorder %s87_s20, %s87_s20 }
  0x61   :  { %p1621_p1 = scmp.ne.s32.totalorder %s87_s20, %s1620_s6  ;;  %p1626_p3 = scmp.lt.s32.totalorder %s1620_s6, %s1620_s6 }
  0x63   :  { %p1627_p4 = por %p1626_p3, %p1625_p2 }
  0x65   :  { %p1628_p5 = pnand %p1627_p4, %p1621_p1 }
  0x67   :  { %1631 = shalt.err (!%p1628_p5)
}
  0x68   :  { %89 = dma.hbm_to_vmem [thread:$0]  %s2045_s8, 64, %s87_s20, [#allocation10]  }
  0x69   :  { %s1632_s28 = scalar_lea.hbm %s2048_s11, 32 }
  0x6a   :  { %p1633_p6 = scmp.ne.s32.totalorder %s2048_s11, %s1632_s28  ;;  %p1636_p7 = scmp.lt.u32.totalorder %s1632_s28, %s2048_s11 }
  0x6c   :  { %p1638_p8 = pnand %p1636_p7, %p1633_p6 }
  0x6e   :  { %1641 = shalt.err (!%p1638_p8)
}
  0x6f   :  { %s1642_s2 = scalar_lea.vmem %s109_s12, 32  ;;  %p1647_p10 = scmp.lt.s32.totalorder %s109_s12, %s109_s12 }
  0x70   :  { %p1643_p9 = scmp.ne.s32.totalorder %s109_s12, %s1642_s2  ;;  %p1648_p11 = scmp.lt.s32.totalorder %s1642_s2, %s1642_s2 }
  0x72   :  { %p1649_p12 = por %p1648_p11, %p1647_p10 }
  0x74   :  { %p1650_p13 = pnand %p1649_p12, %p1643_p9 }
  0x76   :  { %1653 = shalt.err (!%p1650_p13)
}
  0x77   :  { %111 = dma.hbm_to_vmem [thread:$0]  %s2048_s11, 32, %s109_s12, [#allocation13]  }
  0x78   :  { %1654 = dma.done.wait [#allocation5], 512  }
  0x79   :  { %1655 = vsyncadd [#allocation5], 4294966784 }
  0x7a   :  { %1656 = dma.done.wait [#allocation7], 80  }
  0x7b   :  { %1657 = vsyncadd [#allocation7], 4294967216 }
  0x7c   :  { %1658 = dma.done.wait [#allocation10], 4160  }
  0x7d   :  { %1659 = vsyncadd [#allocation10], 4294963136 }
  0x7e   :  { %1660 = dma.done.wait [#allocation13], 64  }
  0x7f   :  { %1661 = vsyncadd [#allocation13], 4294967232  ;;  %v1671_v2 = vmov 0   ;;  %vm189_vm0 = vcmask 1046528   ;;  %v136_v7 = vld [vmem:[%s2037_s0] sm:$0xff]  ;;  %vm185_vm1 = vcmask 113664  }
  0x80   :  { %234 = vmatprep.mubr.bf16.mxu0 %v1671_v2  ;;  %275 = vmatprep.mubr.bf16.mxu1 %v1671_v2  ;;  %v1396_v3 = vld [vmem:[#allocation4 + $0x4] ss:$16 sps:$4 sm:$0x7f]   ;;  %v1398_v4 = vld [vmem:[#allocation4 + $0xc] ss:$16 sps:$4 sm:$0x7f]   ;;  %v137_v10 = vpack.c.bf16 %v136_v7, %v136_v7 }
  0x81   :  { %1242 = vmatprep.subr.msk.bf16.mxu0 %vm189_vm0, %v1396_v3  ;;  %v1400_v5 = vld [vmem:[#allocation4] ss:$16 sps:$4 sm:$0x7f]   ;;  %v1401_v6 = vld [vmem:[#allocation4 + $0x8] ss:$16 sps:$4 sm:$0x7f]   ;;  %1244 = vmatprep.subr.msk.bf16.mxu1 %vm189_vm0, %v1398_v4 }
  0x82   :  { %v191_v8 = vsel %vm189_vm0, %v1400_v5, 0  ;;  %v197_v9 = vsel %vm189_vm0, %v1401_v6, 0  ;;  %v1402_v11 = vld [vmem:[%s2040_s3] ss:$16 sps:$4 sm:$0xff]   ;;  %v1404_v12 = vld [vmem:[%s2040_s3 + $0x4] ss:$16 sps:$4 sm:$0xff]   ;;  %v149_v6 = vlaneseq }
  0x83   :  { %203 = vmatpush1.bf16.msra.mxu0 %v191_v8  ;;  %244 = vmatpush1.bf16.msra.mxu1 %v197_v9  ;;  %v1405_v13 = vld [vmem:[%s2040_s3 + $0x8] ss:$16 sps:$4 sm:$0xff]   ;;  %v1407_v14 = vld [vmem:[%s2040_s3 + $0xc] ss:$16 sps:$4 sm:$0xff]   ;;  %vm359_vm2 = vcmask 1047552   ;;  %v1672_v15 = vmov 65535  }
  0x84   :  { %374 = vmatprep.subr.bf16.mxu0 %v1404_v12  ;;  %v360_v16 = vsel %vm189_vm0, 4294967295, %v1672_v15  ;;  %v1408_v17 = vld [vmem:[%s2040_s3 + $0x20] ss:$16 sps:$4 sm:$0xff]   ;;  %v1410_v18 = vld [vmem:[%s2040_s3 + $0x24] ss:$16 sps:$4 sm:$0xff]   ;;  %425 = vmatprep.subr.bf16.mxu1 %v1407_v14  ;;  %v139_v30 = vld [vmem:[%s2038_s1 + $0x8] sm:$0xff] }
  0x85   :  { %v1411_v19 = vld [vmem:[%s2040_s3 + $0x28] ss:$16 sps:$4 sm:$0xff]   ;;  %v1413_v20 = vld [vmem:[%s2040_s3 + $0x2c] ss:$16 sps:$4 sm:$0xff]   ;;  %v1414_v21 = vld [vmem:[%s2040_s3 + $0x40] ss:$16 sps:$4 sm:$0xff]  }
  0x86   :  { %1243 = vmatmul.mubr.msk.bf16.vlgmr.msra.gmra.mrb[0].mxu0 %vm185_vm1, %v137_v10  ;;  %1245 = vmatmul.mubr.msk.bf16.vlgmr.msra.gmra.mrb[0].mxu1 %vm185_vm1, %v137_v10  ;;  %v361_v22 = vsel %vm359_vm2, %v360_v16, 0  ;;  %v1416_v23 = vld [vmem:[%s2040_s3 + $0x44] ss:$16 sps:$4 sm:$0xff]   ;;  %v1417_v24 = vld [vmem:[%s2040_s3 + $0x48] ss:$16 sps:$4 sm:$0xff]   ;;  %vm352_vm3 = vcmask 384000  }
  0x87   :  { %375 = vmatpush1.bf16.msra.mxu0 %v1402_v11  ;;  %426 = vmatpush1.bf16.msra.mxu1 %v1405_v13  ;;  %v1419_v25 = vld [vmem:[%s2040_s3 + $0x4c] ss:$16 sps:$4 sm:$0xff]   ;;  %v366_v26 = vand.u32 %v1416_v23, %v361_v22  ;;  %v138_v27 = vld [vmem:[%s2038_s1] sm:$0xff]  ;;  %v363_v29 = vand.u32 %v1414_v21, %v361_v22  ;;  %v369_v31 = vand.u32 %v1417_v24, %v361_v22  ;;  %v140_v38 = vld [vmem:[%s2038_s1 + $0x10] sm:$0xff]  ;;  %v2003_v7 = vshrl.u32 %v149_v6, 7 }
  0x88   :  { %376 = vmatprep.subr.bf16.mxu0 %v1410_v18  ;;  %427 = vmatprep.subr.bf16.mxu1 %v1413_v20  ;;  %v372_v28 = vand.u32 %v1419_v25, %v361_v22  ;;  %v1420_v32 = vld [vmem:[%s2042_s5 + $0x40] sm:$0xff]   ;;  %v141_v34 = vpack.c.bf16 %v139_v30, %v138_v27  ;;  %v1424_v37 = vld [vmem:[%s2042_s5 + $0x48] sm:$0xff]   ;;  %v1428_v42 = vld [vmem:[%s2042_s5 + $0x50] sm:$0xff]   ;;  %v142_v44 = vpack.c.bf16 %v140_v38, %v140_v38  ;;  %vm1198_vm4 = vcmask 7168  }
  0x89   :  { %406 = vmatprep.mubr.bf16.mxu0 %v1671_v2  ;;  %457 = vmatprep.mubr.bf16.mxu1 %v1671_v2  ;;  %v1421_v33 = vld [vmem:[%s2042_s5 + $0xc0] sm:$0xff]   ;;  %v1425_v39 = vld [vmem:[%s2042_s5 + $0xc8] sm:$0xff]   ;;  %v1429_v43 = vld [vmem:[%s2042_s5 + $0xd0] sm:$0xff]   ;;  %v2006_v14 = vsub.s32 0, %v2003_v7  ;;  %v159_v18 = vsub.s32 2, %v2003_v7  ;;  %v163_v20 = vsub.s32 3, %v2003_v7 }
  0x8a   :  { %v1422_v35 = vld [vmem:[%s2042_s5] sm:$0xff]   ;;  %v1426_v40 = vld [vmem:[%s2042_s5 + $0x8] sm:$0xff]   ;;  %v1430_v45 = vld [vmem:[%s2042_s5 + $0x10] sm:$0xff]  }
  0x8b   :  { %377 = vmatpush1.bf16.msra.mxu0 %v1408_v17  ;;  %428 = vmatpush1.bf16.msra.mxu1 %v1411_v19  ;;  %v1423_v36 = vld [vmem:[%s2042_s5 + $0x80] sm:$0xff]   ;;  %v1427_v41 = vld [vmem:[%s2042_s5 + $0x88] sm:$0xff]   ;;  %v1431_v46 = vld [vmem:[%s2042_s5 + $0x90] sm:$0xff]   ;;  %v2010_v19 = vsub.s32 1, %v2003_v7 }
  0x8c   :  { %378 = vmatprep.subr.bf16.mxu0 %v366_v26  ;;  %429 = vmatprep.subr.bf16.mxu1 %v372_v28  ;;  %v1432_v47 = vld [vmem:[%s2042_s5 + $0x58] sm:$0xff]   ;;  %v1436_v51 = vld [vmem:[%s2042_s5 + $0x60] sm:$0xff]   ;;  %v1440_v55 = vld [vmem:[%s2042_s5 + $0x68] sm:$0xff]  }
  0x8d   :  { %v1433_v48 = vld [vmem:[%s2042_s5 + $0xd8] sm:$0xff]   ;;  %v1437_v52 = vld [vmem:[%s2042_s5 + $0xe0] sm:$0xff]   ;;  %v1441_v56 = vld [vmem:[%s2042_s5 + $0xe8] sm:$0xff]  }
  0x8e   :  { %v1434_v49 = vld [vmem:[%s2042_s5 + $0x18] sm:$0xff]   ;;  %v1438_v53 = vld [vmem:[%s2042_s5 + $0x20] sm:$0xff]   ;;  %v1442_v57 = vld [vmem:[%s2042_s5 + $0x28] sm:$0xff]  }
  0x8f   :  { %379 = vmatpush1.bf16.msra.mxu0 %v363_v29  ;;  %430 = vmatpush1.bf16.msra.mxu1 %v369_v31  ;;  %v1435_v50 = vld [vmem:[%s2042_s5 + $0x98] sm:$0xff]   ;;  %v1439_v54 = vld [vmem:[%s2042_s5 + $0xa0] sm:$0xff]   ;;  %v1443_v58 = vld [vmem:[%s2042_s5 + $0xa8] sm:$0xff]  }
  0x90   :  { %1329 = vmatprep.subr.bf16.mxu0 %v1420_v32  ;;  %1357 = vmatprep.subr.bf16.mxu1 %v1421_v33  ;;  %v1444_v59 = vld [vmem:[%s2042_s5 + $0x70] sm:$0xff]   ;;  %v1448_v63 = vld [vmem:[%s2042_s5 + $0x78] sm:$0xff]   ;;  %v147_v17 = vld [vmem:[#allocation6] sm:$0xf] }
  0x91   :  { %v1445_v60 = vld [vmem:[%s2042_s5 + $0xf0] sm:$0xff]   ;;  %v1449_v0 = vld [vmem:[%s2042_s5 + $0xf8] sm:$0xff]   ;;  %v152_v21 = vrot.slane %v147_v17, %v2006_v14  ;;  %v160_v22 = vrot.slane %v147_v17, %v159_v18  ;;  %v156_v23 = vrot.slane %v147_v17, %v2010_v19  ;;  %v164_v24 = vrot.slane %v147_v17, %v163_v20 }
  0x92   :  { %1258 = vmatmul.mubr.msk.bf16.vlgmr.msra.gmra.mrb[4].mxu0 %vm352_vm3, %v141_v34  ;;  %1260 = vmatmul.mubr.msk.bf16.vlgmr.msra.gmra.mrb[4].mxu1 %vm352_vm3, %v141_v34  ;;  %v1446_v61 = vld [vmem:[%s2042_s5 + $0x30] sm:$0xff]   ;;  %v1450_v1 = vld [vmem:[%s2042_s5 + $0x38] sm:$0xff]  }
  0x93   :  { %416 = vmatprep.mubr.bf16.mxu0 %v1671_v2  ;;  %467 = vmatprep.mubr.bf16.mxu1 %v1671_v2  ;;  %v1447_v62 = vld [vmem:[%s2042_s5 + $0xb0] sm:$0xff]   ;;  %v1451_v3 = vld [vmem:[%s2042_s5 + $0xb8] sm:$0xff]  }
  0x94   :  { %1330 = vmatpush3.bf16.msra.mxu0 %v1422_v35  ;;  %1358 = vmatpush3.bf16.msra.mxu1 %v1423_v36  ;;  %v1454_v4 = vld [vmem:[#allocation9 + $0x4] ss:$16 sps:$4 sm:$0xff]   ;;  %v1457_v5 = vld [vmem:[#allocation9 + $0xc] ss:$16 sps:$4 sm:$0xff]  }
  0x95   :  { %1331 = vmatprep.subr.bf16.mxu0 %v1424_v37  ;;  %1359 = vmatprep.subr.bf16.mxu1 %v1425_v39 }
  0x98   :  { %1332 = vmatpush3.bf16.msra.mxu0 %v1426_v40  ;;  %1360 = vmatpush3.bf16.msra.mxu1 %v1427_v41 }
  0x99   :  { %1333 = vmatprep.subr.bf16.mxu0 %v1428_v42  ;;  %1361 = vmatprep.subr.bf16.mxu1 %v1429_v43 }
  0x9a   :  { %1259 = vmatmul.mubr.msk.bf16.gmra.mrb[8].mxu0 %vm352_vm3, %v142_v44  ;;  %1261 = vmatmul.mubr.msk.bf16.gmra.mrb[8].mxu1 %vm352_vm3, %v142_v44 }
  0x9c   :  { %1334 = vmatpush3.bf16.msra.mxu0 %v1430_v45  ;;  %1362 = vmatpush3.bf16.msra.mxu1 %v1431_v46 }
  0x9d   :  { %1335 = vmatprep.subr.bf16.mxu0 %v1432_v47  ;;  %1363 = vmatprep.subr.bf16.mxu1 %v1433_v48 }
  0xa0   :  { %1336 = vmatpush3.bf16.msra.mxu0 %v1434_v49  ;;  %1364 = vmatpush3.bf16.msra.mxu1 %v1435_v50 }
  0xa1   :  { %1337 = vmatprep.subr.bf16.mxu0 %v1436_v51  ;;  %1365 = vmatprep.subr.bf16.mxu1 %v1437_v52 }
  0xa4   :  { %1338 = vmatpush3.bf16.msra.mxu0 %v1438_v53  ;;  %1366 = vmatpush3.bf16.msra.mxu1 %v1439_v54 }
  0xa5   :  { %1339 = vmatprep.subr.bf16.mxu0 %v1440_v55  ;;  %1367 = vmatprep.subr.bf16.mxu1 %v1441_v56 }
  0xa8   :  { %1340 = vmatpush3.bf16.msra.mxu0 %v1442_v57  ;;  %1368 = vmatpush3.bf16.msra.mxu1 %v1443_v58  ;;  %v1452_v57 = vld [vmem:[#allocation9] ss:$16 sps:$4 sm:$0xff]  }
  0xa9   :  { %1341 = vmatprep.subr.bf16.mxu0 %v1444_v59  ;;  %1369 = vmatprep.subr.bf16.mxu1 %v1445_v60 }
  0xac   :  { %1342 = vmatpush3.bf16.msra.mxu0 %v1446_v61  ;;  %1370 = vmatpush3.bf16.msra.mxu1 %v1447_v62  ;;  %v1455_v62 = vld [vmem:[#allocation9 + $0x8] ss:$16 sps:$4 sm:$0xff]  }
  0xad   :  { %1343 = vmatprep.subr.bf16.mxu0 %v1448_v63  ;;  %1371 = vmatprep.subr.bf16.mxu1 %v1449_v0  ;;  %v1460_v63 = vld [vmem:[#allocation9 + $0x24] ss:$16 sps:$4 sm:$0xff]  }
  0xb0   :  { %1344 = vmatpush3.bf16.msra.mxu0 %v1450_v1  ;;  %1372 = vmatpush3.bf16.msra.mxu1 %v1451_v3 }
  0xb1   :  { %1087 = vmatprep.subr.bf16.mxu0 %v1454_v4  ;;  %1128 = vmatprep.subr.bf16.mxu1 %v1457_v5  ;;  %v1463_v5 = vld [vmem:[#allocation9 + $0x2c] ss:$16 sps:$4 sm:$0xff]  }
 0x159   :  { %v236_v8 = vpop.f32.mrb[0].mxu0  ;;  %v277_v9 = vpop.f32.mrb[0].mxu1 }
 0x15a   :  { %v238_v10 = vpop.f32.mrb[1].mxu0  ;;  %v279_v11 = vpop.f32.mrb[1].mxu1  ;;  %v237_v25 = vadd.f32 %v236_v8, %v152_v21  ;;  %v278_v26 = vadd.f32 %v277_v9, %v160_v22  ;;  %v1466_v22 = vld [vmem:[#allocation9 + $0x44] ss:$16 sps:$4 sm:$0xff]  }
 0x15b   :  { %v240_v12 = vpop.f32.mrb[2].mxu0  ;;  %v281_v13 = vpop.f32.mrb[2].mxu1  ;;  %v239_v27 = vadd.f32 %v238_v10, %v156_v23  ;;  %v280_v29 = vadd.f32 %v279_v11, %v164_v24  ;;  %v1469_v23 = vld [vmem:[#allocation9 + $0x4c] ss:$16 sps:$4 sm:$0xff]  }
 0x15c   :  { %v241_v15 = vpop.f32.mrb[3].mxu0  ;;  %v282_v16 = vpop.f32.mrb[3].mxu1  ;;  %v1458_v12 = vld [vmem:[#allocation9 + $0x20] ss:$16 sps:$4 sm:$0xff]  }
 0x15d   :  { %v1461_v16 = vld [vmem:[#allocation9 + $0x28] ss:$16 sps:$4 sm:$0xff]  }
 0x165   :  { %v408_v28 = vpop.f32.mrb[4].mxu0  ;;  %v459_v31 = vpop.f32.mrb[4].mxu1 }
 0x166   :  { %v476_v30 = vadd.f32 %v408_v28, %v237_v25  ;;  %v410_v32 = vpop.f32.mrb[5].mxu0  ;;  %v478_v33 = vadd.f32 %v459_v31, %v278_v26  ;;  %v461_v35 = vpop.f32.mrb[5].mxu1  ;;  %v1470_v31 = vld [vmem:[#allocation9 + $0x60] ss:$16 sps:$4 sm:$0xff]  }
 0x167   :  { %v477_v34 = vadd.f32 %v410_v32, %v239_v27  ;;  %v412_v36 = vpop.f32.mrb[6].mxu0  ;;  %v479_v37 = vadd.f32 %v461_v35, %v280_v29  ;;  %v463_v39 = vpop.f32.mrb[6].mxu1  ;;  %v1473_v32 = vld [vmem:[#allocation9 + $0x68] ss:$16 sps:$4 sm:$0xff]   ;;  %v1476_v35 = vld [vmem:[#allocation9 + $0x80] ss:$16 sps:$4 sm:$0xff]  }
 0x168   :  { %v480_v38 = vadd.f32 %v412_v36, %v237_v25  ;;  %v414_v40 = vpop.f32.mrb[7].mxu0  ;;  %v482_v41 = vadd.f32 %v463_v39, %v278_v26  ;;  %v465_v43 = vpop.f32.mrb[7].mxu1  ;;  %v488_v44 = vmax.f32 %v476_v30, 0.0  ;;  %v490_v47 = vmax.f32 %v478_v33, 0.0  ;;  %v1475_v30 = vld [vmem:[#allocation9 + $0x6c] ss:$16 sps:$4 sm:$0xff]  }
 0x169   :  { %v481_v42 = vadd.f32 %v414_v40, %v239_v27  ;;  %v483_v46 = vadd.f32 %v465_v43, %v280_v29  ;;  %v489_v48 = vmax.f32 %v477_v34, 0.0  ;;  %v491_v51 = vmax.f32 %v479_v37, 0.0  ;;  %v1478_v33 = vld [vmem:[#allocation9 + $0x84] ss:$16 sps:$4 sm:$0xff]   ;;  %v1481_v34 = vld [vmem:[#allocation9 + $0x8c] ss:$16 sps:$4 sm:$0xff]  }
 0x16a   :  { %v492_v45 = vmax.f32 %v480_v38, 0.0  ;;  %v494_v49 = vmax.f32 %v482_v41, 0.0  ;;  %v1479_v36 = vld [vmem:[#allocation9 + $0x88] ss:$16 sps:$4 sm:$0xff]   ;;  %v1484_v37 = vld [vmem:[#allocation9 + $0xa4] ss:$16 sps:$4 sm:$0xff]  }
 0x16b   :  { %v493_v50 = vmax.f32 %v481_v42, 0.0  ;;  %v495_v53 = vmax.f32 %v483_v46, 0.0  ;;  %v1487_v38 = vld [vmem:[#allocation9 + $0xac] ss:$16 sps:$4 sm:$0xff]   ;;  %v1482_v39 = vld [vmem:[#allocation9 + $0xa0] ss:$16 sps:$4 sm:$0xff]  }
 0x16c   :  { %v500_v52 = vpack.c.bf16 %v492_v45, %v488_v44  ;;  %v502_v54 = vpack.c.bf16 %v494_v49, %v490_v47  ;;  %v1490_v40 = vld [vmem:[#allocation9 + $0xc4] ss:$16 sps:$4 sm:$0xff]   ;;  %v1493_v41 = vld [vmem:[#allocation9 + $0xcc] ss:$16 sps:$4 sm:$0xff]   ;;  %v1488_v42 = vld [vmem:[#allocation9 + $0xc0] ss:$16 sps:$4 sm:$0xff]  }
 0x16d   :  { %v501_v55 = vpack.c.bf16 %v493_v50, %v489_v48  ;;  %v418_v56 = vpop.f32.mrb[8].mxu0  ;;  %v503_v58 = vpack.c.bf16 %v495_v53, %v491_v51  ;;  %v469_v60 = vpop.f32.mrb[8].mxu1  ;;  %v1491_v43 = vld [vmem:[#allocation9 + $0xc8] ss:$16 sps:$4 sm:$0xff]   ;;  %v1496_v44 = vld [vmem:[#allocation9 + $0xe4] ss:$16 sps:$4 sm:$0xff]  }
 0x16e   :  { %v484_v59 = vadd.f32 %v418_v56, %v237_v25  ;;  %v420_v61 = vpop.f32.mrb[9].mxu0  ;;  %v486_v0 = vadd.f32 %v469_v60, %v278_v26  ;;  %v471_v3 = vpop.f32.mrb[9].mxu1  ;;  %v1464_v25 = vld [vmem:[#allocation9 + $0x40] ss:$16 sps:$4 sm:$0xff]   ;;  %v1499_v45 = vld [vmem:[#allocation9 + $0xec] ss:$16 sps:$4 sm:$0xff]  }
 0x16f   :  { %v485_v1 = vadd.f32 %v420_v61, %v239_v27  ;;  %v422_v4 = vpop.f32.mrb[10].mxu0  ;;  %803 = vmatprep.mubr.bf16.mxu0 %v501_v55  ;;  %v487_v6 = vadd.f32 %v471_v3, %v280_v29  ;;  %851 = vmatprep.mubr.bf16.mxu1 %v503_v58  ;;  %v473_v9 = vpop.f32.mrb[10].mxu1  ;;  %v1467_v27 = vld [vmem:[#allocation9 + $0x48] ss:$16 sps:$4 sm:$0xff]   ;;  %v1472_v29 = vld [vmem:[#allocation9 + $0x64] ss:$16 sps:$4 sm:$0xff]  }
 0x170   :  { %v423_v8 = vpop.f32.mrb[11].mxu0  ;;  %804 = vmatmul.mubr.bf16.vlgmr.msra.gmra.mrb[12].mxu0 %v500_v52  ;;  %852 = vmatmul.mubr.bf16.vlgmr.msra.gmra.mrb[12].mxu1 %v502_v54  ;;  %v474_v11 = vpop.f32.mrb[11].mxu1  ;;  %v496_v13 = vmax.f32 %v484_v59, 0.0  ;;  %v498_v17 = vmax.f32 %v486_v0, 0.0  ;;  %v1494_v46 = vld [vmem:[#allocation9 + $0xe0] ss:$16 sps:$4 sm:$0xff]  }
 0x171   :  { %v497_v10 = vmax.f32 %v485_v1, 0.0  ;;  %1088 = vmatpush1.bf16.msra.mxu0 %v1452_v57  ;;  %v499_v15 = vmax.f32 %v487_v6, 0.0  ;;  %1129 = vmatpush1.bf16.msra.mxu1 %v1455_v62  ;;  %v1497_v47 = vld [vmem:[#allocation9 + $0xe8] ss:$16 sps:$4 sm:$0xff]   ;;  %v1262_v50 = vld [vmem:[#allocation8] ss:$0 sm:$0xff] }
 0x172   :  { %1089 = vmatprep.subr.bf16.mxu0 %v1460_v63  ;;  %1130 = vmatprep.subr.bf16.mxu1 %v1463_v5  ;;  %v504_v26 = vpack.c.bf16 %v496_v13, %v496_v13  ;;  %v506_v28 = vpack.c.bf16 %v498_v17, %v498_v17 }
 0x173   :  { %v505_v21 = vpack.c.bf16 %v497_v10, %v497_v10  ;;  %v507_v24 = vpack.c.bf16 %v499_v15, %v499_v15 }
 0x175   :  { %811 = vmatprep.mubr.bf16.mxu0 %v505_v21  ;;  %1090 = vmatpush1.bf16.msra.mxu0 %v1458_v12 }
 0x176   :  { %859 = vmatprep.mubr.bf16.mxu1 %v507_v24  ;;  %1131 = vmatpush1.bf16.msra.mxu1 %v1461_v16 }
 0x177   :  { %1091 = vmatprep.subr.bf16.mxu0 %v1466_v22  ;;  %1132 = vmatprep.subr.bf16.mxu1 %v1469_v23 }
 0x178   :  { %812 = vmatmul.mubr.bf16.gmra.mrb[16].mxu0 %v504_v26  ;;  %860 = vmatmul.mubr.bf16.gmra.mrb[16].mxu1 %v506_v28  ;;  %v1200_v28 = vld [vmem:[#allocation14] sm:$0x3] }
 0x179   :  { %1092 = vmatpush1.bf16.msra.mxu0 %v1464_v25  ;;  %1119 = vmatprep.mubr.bf16.mxu0 %v1671_v2  ;;  %v905_v25 = vld [vmem:[#allocation11] sm:$0xf] }
 0x17a   :  { %1133 = vmatpush1.bf16.msra.mxu1 %v1467_v27  ;;  %1160 = vmatprep.mubr.bf16.mxu1 %v1671_v2  ;;  %v1485_v2 = vld [vmem:[#allocation9 + $0xa8] ss:$16 sps:$4 sm:$0xff]   ;;  %v910_v26 = vrot.slane %v905_v25, %v2006_v14  ;;  %v918_v27 = vrot.slane %v905_v25, %v159_v18  ;;  %v1209_v18 = vrot.slane %v1200_v28, %v2010_v19 }
 0x17b   :  { %1093 = vmatprep.subr.bf16.mxu0 %v1472_v29  ;;  %1134 = vmatprep.subr.bf16.mxu1 %v1475_v30  ;;  %v914_v29 = vrot.slane %v905_v25, %v2010_v19  ;;  %v922_v30 = vrot.slane %v905_v25, %v163_v20 }
 0x17d   :  { %1094 = vmatpush1.bf16.msra.mxu0 %v1470_v31  ;;  %v1173_v31 = vld [vmem:[#allocation12] sm:$0x3] }
 0x17e   :  { %1135 = vmatpush1.bf16.msra.mxu1 %v1473_v32  ;;  %1095 = vmatprep.subr.bf16.mxu0 %v1478_v33  ;;  %v1182_v7 = vrot.slane %v1173_v31, %v2010_v19 }
 0x17f   :  { %1136 = vmatprep.subr.bf16.mxu1 %v1481_v34 }
 0x181   :  { %1096 = vmatpush1.bf16.msra.mxu0 %v1476_v35 }
 0x182   :  { %1137 = vmatpush1.bf16.msra.mxu1 %v1479_v36  ;;  %1097 = vmatprep.subr.bf16.mxu0 %v1484_v37  ;;  %v1205_v36 = vrot.slane %v1200_v28, %v2006_v14 }
 0x183   :  { %1138 = vmatprep.subr.bf16.mxu1 %v1487_v38 }
 0x185   :  { %1098 = vmatpush1.bf16.msra.mxu0 %v1482_v39  ;;  %v1178_v39 = vrot.slane %v1173_v31, %v2006_v14 }
 0x186   :  { %1139 = vmatpush1.bf16.msra.mxu1 %v1485_v2  ;;  %1099 = vmatprep.subr.bf16.mxu0 %v1490_v40 }
 0x187   :  { %1140 = vmatprep.subr.bf16.mxu1 %v1493_v41 }
 0x189   :  { %1100 = vmatpush1.bf16.msra.mxu0 %v1488_v42 }
 0x18a   :  { %1141 = vmatpush1.bf16.msra.mxu1 %v1491_v43  ;;  %1101 = vmatprep.subr.bf16.mxu0 %v1496_v44 }
 0x18b   :  { %1142 = vmatprep.subr.bf16.mxu1 %v1499_v45 }
 0x18d   :  { %1102 = vmatpush1.bf16.msra.mxu0 %v1494_v46 }
 0x18e   :  { %1143 = vmatpush1.bf16.msra.mxu1 %v1497_v47 }
 0x243   :  { %v1345_v48 = vpop.f32.mrb[12].mxu0  ;;  %v1373_v49 = vpop.f32.mrb[12].mxu1 }
 0x244   :  { %v1346_v51 = vpop.f32.mrb[13].mxu0  ;;  %v1374_v53 = vpop.f32.mrb[13].mxu1 }
 0x245   :  { %v1347_v52 = vadd.f32 %v1346_v51, %v1345_v48  ;;  %v1348_v54 = vpop.f32.mrb[14].mxu0  ;;  %v1375_v55 = vadd.f32 %v1374_v53, %v1373_v49  ;;  %v1376_v56 = vpop.f32.mrb[14].mxu1  ;;  %v1327_v53 = vld [vmem:[#allocation2] ss:$0 sm:$0xff] }
 0x246   :  { %v1349_v57 = vpop.f32.mrb[15].mxu0  ;;  %v1377_v60 = vpop.f32.mrb[15].mxu1 }
 0x247   :  { %v806_v58 = vadd.f32 %v1347_v52, %v1262_v50  ;;  %v1350_v59 = vadd.f32 %v1349_v57, %v1348_v54  ;;  %v1378_v61 = vadd.f32 %v1377_v60, %v1376_v56  ;;  %v1328_v56 = vld [vmem:[#allocation3] ss:$0 sm:$0xff] }
 0x249   :  { %v854_v62 = vadd.f32 %v1375_v55, %v806_v58  ;;  %v809_v63 = vadd.f32 %v1350_v59, %v1262_v50 }
 0x24b   :  { %v857_v0 = vadd.f32 %v1378_v61, %v809_v63  ;;  %v1351_v1 = vpop.f32.mrb[16].mxu0  ;;  %v1379_v3 = vpop.f32.mrb[16].mxu1  ;;  %v867_v5 = vmax.f32 %v854_v62, 0.0 }
 0x24c   :  { %v1352_v4 = vpop.f32.mrb[17].mxu0  ;;  %v1380_v9 = vpop.f32.mrb[17].mxu1 }
 0x24d   :  { %v868_v6 = vmax.f32 %v857_v0, 0.0  ;;  %v1353_v8 = vadd.f32 %v1352_v4, %v1351_v1  ;;  %v1354_v10 = vpop.f32.mrb[18].mxu0  ;;  %v1381_v11 = vadd.f32 %v1380_v9, %v1379_v3  ;;  %v1382_v12 = vpop.f32.mrb[18].mxu1 }
 0x24e   :  { %v1355_v13 = vpop.f32.mrb[19].mxu0  ;;  %v1383_v17 = vpop.f32.mrb[19].mxu1 }
 0x24f   :  { %v870_v15 = vadd.f32 %v868_v6, %v867_v5  ;;  %v814_v16 = vadd.f32 %v1353_v8, %v1262_v50 }
 0x251   :  { %v862_v21 = vadd.f32 %v1381_v11, %v814_v16 }
 0x253   :  { %v869_v22 = vmax.f32 %v862_v21, 0.0 }
 0x255   :  { %v871_v23 = vadd.f32 %v870_v15, %v869_v22 }
 0x257   :  { %v872_v24 = vpack.c.bf16 %v871_v23, %v871_v23 }
 0x259   :  { %1120 = vmatmul.mubr.bf16.vlgmr.msra.gmra.mrb[20].mxu0 %v872_v24  ;;  %1161 = vmatmul.mubr.bf16.vlgmr.msra.gmra.mrb[20].mxu1 %v872_v24 }
 0x32c   :  { %v1121_v32 = vpop.f32.mrb[20].mxu0  ;;  %v1162_v33 = vpop.f32.mrb[20].mxu1 }
 0x32d   :  { %v1122_v34 = vadd.f32 %v1121_v32, %v910_v26  ;;  %v1163_v35 = vadd.f32 %v1162_v33, %v918_v27  ;;  %v1123_v37 = vpop.f32.mrb[21].mxu0  ;;  %v1164_v38 = vpop.f32.mrb[21].mxu1 }
 0x32e   :  { %v1124_v2 = vadd.f32 %v1123_v37, %v914_v29  ;;  %v1165_v40 = vadd.f32 %v1164_v38, %v922_v30  ;;  %v1125_v41 = vpop.f32.mrb[22].mxu0  ;;  %v1166_v42 = vpop.f32.mrb[22].mxu1 }
 0x32f   :  { %v1169_v20 = vmax.f32 %v1122_v34, 0.0  ;;  %v1171_v43 = vmax.f32 %v1163_v35, 0.0  ;;  %v1126_v44 = vpop.f32.mrb[23].mxu0  ;;  %v1167_v45 = vpop.f32.mrb[23].mxu1 }
 0x330   :  { %v1170_v46 = vmax.f32 %v1124_v2, 0.0  ;;  %v1172_v47 = vmax.f32 %v1165_v40, 0.0 }
 0x331   :  { %v1212_v48 = vmul.f32 %v1205_v36, %v1171_v43  ;;  %v1185_v49 = vmul.f32 %v1178_v39, %v1169_v20 }
 0x332   :  { %v1213_v50 = vmul.f32 %v1209_v18, %v1172_v47  ;;  %v1186_v51 = vmul.f32 %v1182_v7, %v1170_v46 }
 0x334   :  { %v1187_v52 = vadd.f32 %v1186_v51, %v1185_v49  ;;  %v1214_v14 = vadd.f32 %v1213_v50, %v1212_v48 }
 0x336   :  { %1188 = vadd.xlane.f32.xlu0 %v1187_v52 }
 0x33a   :  { %1215 = vadd.xlane.f32.xlu0 %v1214_v14 }
 0x3c3   :  { %v1189_v54 = vpop.xlane.xlu0 %1188 }
 0x3c4   :  { %v1197_v55 = vadd.f32 %v1327_v53, %v1189_v54 }
 0x3c6   :  { %1199 = vst.msk [vmem:[%s2049_s13] sm:$0xff] %vm1198_vm4, %v1197_v55 }
 0x3c7   :  { %v1216_v19 = vpop.xlane.xlu0 %1215 }
 0x3c8   :  { %v1224_v57 = vadd.f32 %v1328_v56, %v1216_v19 }
 0x3ca   :  { %1225 = vst.msk [vmem:[%s2050_s14] sm:$0xff] %vm1198_vm4, %v1224_v57 }
 0x3cb   :  { %1234 = vsyncpa [#allocation5], 1 }
 0x3cc   :  { %1235 = vsyncpa [#allocation7], 1 }
 0x3cd   :  { %1236 = vsyncpa [#allocation10], 1 }
 0x3ce   :  { %1237 = vsyncpa [#allocation13], 1 }

</bundles_post_ra>
